<compile_context>
chip_gen: v7x
topology: tpu7x:2x2x1
jax: 0.10.0
libtpu: 0.0.40
codegen_flags: <defaults>
</compile_context>

<pallas_src>
import functools

import jax
import jax.numpy as jnp
from jax.experimental import pallas as pl
from jax.experimental.pallas import tpu as pltpu

_MiB = 1024 * 1024


# ---------------------------------------------------------------------------
# In-kernel helpers
# ---------------------------------------------------------------------------

def _spatial_sum(x2d, channels_last):
    """Sum a 2-D tile over its spatial axis with f32 accumulation.

    Returns (1, C) for channels_last, (C, 1) otherwise.  Sub-32-bit inputs are
    reduced on the MXU (dot with a ones vector, f32 accumulator) so no full
    f32 copy of the tile is ever materialized; f32 inputs reduce directly.
    """
    if channels_last:                                   # x2d: (hw, C)
        if x2d.dtype.itemsize < 4:
            ones = jnp.ones((1, x2d.shape[0]), x2d.dtype)
            return jnp.dot(ones, x2d, preferred_element_type=jnp.float32)
        return jnp.sum(x2d.astype(jnp.float32), axis=0, keepdims=True)
    # x2d: (C, hw)
    if x2d.dtype.itemsize < 4:
        ones = jnp.ones((x2d.shape[1], 1), x2d.dtype)
        return jnp.dot(x2d, ones, preferred_element_type=jnp.float32)
    return jnp.sum(x2d.astype(jnp.float32), axis=1, keepdims=True)


def _excite(pooled_row, w1_ref, b1_ref, w2_ref, b2_ref):
    """Tiny excitation MLP.  pooled_row: (1, C) f32 -> gate (1, C) f32."""
    h = jnp.dot(pooled_row, w1_ref[...],
                preferred_element_type=jnp.float32) + b1_ref[...].astype(jnp.float32)
    h = jnp.maximum(h, 0.0)
    z = jnp.dot(h, w2_ref[...],
                preferred_element_type=jnp.float32) + b2_ref[...].astype(jnp.float32)
    return jax.nn.sigmoid(z)


def _pool_and_excite(x2d, w1_ref, b1_ref, w2_ref, b2_ref, channels_last):
    """Full squeeze + excite on one 2-D slab -> gate (1, C) f32."""
    s = _spatial_sum(x2d, channels_last)
    if not channels_last:
        s = s.reshape(1, -1)                            # (C,1) -> (1,C), C elems
    hw = x2d.shape[0] if channels_last else x2d.shape[1]
    return _excite(s * (1.0 / hw), w1_ref, b1_ref, w2_ref, b2_ref)


# ---------------------------------------------------------------------------
# Kernels
# ---------------------------------------------------------------------------

def _se_fused_kernel(x_ref, w1_ref, b1_ref, w2_ref, b2_ref, o_ref, *, channels_last):
    """One batch sample per grid step: squeeze + excite + scale fused."""
    x = x_ref[0]                                        # (C, HW) or (HW, C)
    gate = _pool_and_excite(x, w1_ref, b1_ref, w2_ref, b2_ref,
                            channels_last).astype(x.dtype)          # (1, C)
    if channels_last:
        o_ref[0] = (x * gate).astype(o_ref.dtype)        # lane broadcast (free)
    else:
        o_ref[0] = (x * gate.reshape(-1, 1)).astype(o_ref.dtype)


def _se_fused_manual_kernel(x_hbm, w1_ref, b1_ref, w2_ref, b2_ref, o_hbm,
                            buf, sem, *, channels_last):
    """Manual-DMA fused variant: one VMEM slab, scaled in place (2x traffic)."""
    b = pl.program_id(0)
    cp_in = pltpu.make_async_copy(x_hbm.at[b], buf, sem.at[0])
    cp_in.start()
    cp_in.wait()
    x = buf[...]                                        # (C, HW) or (HW, C)
    gate = _pool_and_excite(x, w1_ref, b1_ref, w2_ref, b2_ref,
                            channels_last).astype(x.dtype)
    if channels_last:
        buf[...] = (x * gate).astype(buf.dtype)
    else:
        buf[...] = (x * gate.reshape(-1, 1)).astype(buf.dtype)
    cp_out = pltpu.make_async_copy(buf, o_hbm.at[b], sem.at[1])
    cp_out.start()
    cp_out.wait()


def _pool_gate_kernel(x_ref, w1_ref, b1_ref, w2_ref, b2_ref, gate_ref, sum_ref,
                      *, hw_total, hw_tile, mask_tail, channels_last):
    """Pass 1: tiled spatial-sum reduction + excitation MLP in the epilogue.

    The gate (one (1,C) vector per sample) is the kernel output; the f32 sum
    accumulator lives in scratch and is resident over the HW grid axis.
    """
    h = pl.program_id(1)
    nh = pl.num_programs(1)

    @pl.when(h == 0)
    def _():
        sum_ref[...] = jnp.zeros_like(sum_ref)

    def tile_sum(apply_mask):
        x = x_ref[0]                                    # (C, t) or (t, C)
        if apply_mask:
            axis = 0 if channels_last else 1
            pos = jax.lax.broadcasted_iota(jnp.int32, x.shape, axis) + h * hw_tile
            x = jnp.where(pos < hw_total, x, jnp.zeros_like(x))
        return _spatial_sum(x, channels_last)

    if mask_tail:
        # Mask work (iota + select) only on the last, partial HW tile.
        @pl.when(h < nh - 1)
        def _():
            sum_ref[...] += tile_sum(False)

        @pl.when(h == nh - 1)
        def _():
            sum_ref[...] += tile_sum(True)
    else:
        sum_ref[...] += tile_sum(False)

    @pl.when(h == nh - 1)
    def _():
        pooled = sum_ref[...]
        if not channels_last:
            pooled = pooled.reshape(1, -1)              # (C,1) -> (1,C)
        gate = _excite(pooled * (1.0 / hw_total),
                       w1_ref, b1_ref, w2_ref, b2_ref).astype(gate_ref.dtype)
        if channels_last:
            gate_ref[0] = gate                          # block (1, 1, C)
        else:
            gate_ref[0] = gate.reshape(-1, 1)           # block (1, C, 1)


def _scale_kernel(x_ref, gate_ref, o_ref):
    """Pass 2: channel-wise scale, fully parallel over (B, HW tiles)."""
    # Shapes broadcast for both layouts: (1,C,t)*(1,C,1) or (1,t,C)*(1,1,C).
    o_ref[...] = (x_ref[...] * gate_ref[...]).astype(o_ref.dtype)


# ---------------------------------------------------------------------------
# Wrapper
# ---------------------------------------------------------------------------

def _vmem_capacity_bytes():
    try:
        return int(pltpu.get_tpu_info().vmem_capacity_bytes)
    except Exception:
        return 64 * _MiB   # conservative default (v7x per-TensorCore VMEM)


def _vmem_limit_bytes(cap, needed):
    return int(min(0.9 * cap, max(needed + 2 * _MiB, 32 * _MiB)))


def se_layer(x, w1, b1, w2, b2, *, channels_last=False, force_two_pass=False,
             force_manual=False, hw_tile=None):
    """SELayer forward.

    x: (B, C, H, W) if channels_last=False, else (B, H, W, C).
    w1: (C, Cr), b1: (Cr,), w2: (Cr, C), b2: (C,)  — weights stored (in, out),
    i.e. transposed w.r.t. torch.nn.Linear.weight.
    """
    if channels_last:
        B, H, W, C = x.shape
    else:
        B, C, H, W = x.shape
    HW = H * W
    Cr = w1.shape[1]
    dtype = x.dtype
    itemsize = jnp.dtype(dtype).itemsize
    xr = x.reshape((B, HW, C) if channels_last else (B, C, HW))
    b1r = b1.reshape(1, Cr)
    b2r = b2.reshape(1, C)

    cap = _vmem_capacity_bytes()
    slab = C * HW * itemsize
    fused_auto_bytes = 4 * slab + 2 * _MiB      # in + out tiles, double-buffered
    manual_bytes = slab + 2 * _MiB              # one in-place VMEM slab

    use_fused = use_manual = False
    if force_manual:
        use_manual = True
    elif not force_two_pass:
        if fused_auto_bytes <= int(0.85 * cap):
            use_fused = True
        elif manual_bytes <= int(0.85 * cap):
            use_manual = True

    if channels_last:
        x_full_spec = pl.BlockSpec((1, HW, C), lambda b: (b, 0, 0))
    else:
        x_full_spec = pl.BlockSpec((1, C, HW), lambda b: (b, 0, 0))
    w_specs_1d = [pl.BlockSpec((C, Cr), lambda b: (0, 0)),
                  pl.BlockSpec((1, Cr), lambda b: (0, 0)),
                  pl.BlockSpec((Cr, C), lambda b: (0, 0)),
                  pl.BlockSpec((1, C), lambda b: (0, 0))]

    # TODO(synk): on 2-TC chips (v7x) the fused grid=(B,) leaves a core idle
    # when B == 1; route such shapes to the two-pass (B, n_hw)-parallel path or
    # split C once a reliable per-chip core-count query is available.

    # ------------------------- Fused (auto-pipelined) -----------------------
    if use_fused:
        out = pl.pallas_call(
            functools.partial(_se_fused_kernel, channels_last=channels_last),
            out_shape=jax.ShapeDtypeStruct(xr.shape, dtype),
            grid=(B,),
            in_specs=[x_full_spec] + w_specs_1d,
            out_specs=x_full_spec,
            compiler_params=pltpu.CompilerParams(
                dimension_semantics=("parallel",),
                vmem_limit_bytes=_vmem_limit_bytes(cap, fused_auto_bytes)),
        )(xr, w1, b1r, w2, b2r)
        return out.reshape(x.shape)

    # ------------------- Fused, manual DMA, in-place scale ------------------
    if use_manual:
        buf_shape = (HW, C) if channels_last else (C, HW)
        out = pl.pallas_call(
            functools.partial(_se_fused_manual_kernel, channels_last=channels_last),
            out_shape=jax.ShapeDtypeStruct(xr.shape, dtype),
            grid=(B,),
            in_specs=[pl.BlockSpec(memory_space=pl.ANY)] + w_specs_1d,
            out_specs=pl.BlockSpec(memory_space=pl.ANY),
            scratch_shapes=[pltpu.VMEM(buf_shape, dtype),
                            pltpu.SemaphoreType.DMA((2,))],
            compiler_params=pltpu.CompilerParams(
                dimension_semantics=("parallel",),
                has_side_effects=True,
                vmem_limit_bytes=_vmem_limit_bytes(cap, manual_bytes)),
        )(xr, w1, b1r, w2, b2r)
        return out.reshape(x.shape)

    # ----------------- Two-pass tiled path (reduce+gate, scale) -------------
    align = 8 if channels_last else 128          # sublane vs lane alignment
    min_tile = 64 if channels_last else 512
    if hw_tile is None:
        target = max(4 * _MiB, cap // 16)        # scale tile with VMEM capacity
        t = (target // max(1, C * itemsize)) // align * align
        t = max(min_tile, t)
        hw_tile = HW if t >= HW else t
    else:
        hw_tile = min(int(hw_tile), HW)
        if hw_tile < HW:
            hw_tile = max(align, hw_tile // align * align)
    n_hw = pl.cdiv(HW, hw_tile)
    mask_tail = (HW % hw_tile) != 0

    tile_bytes = C * hw_tile * itemsize
    vmem_limit = _vmem_limit_bytes(cap, 4 * tile_bytes)

    if channels_last:
        x_tile_spec = pl.BlockSpec((1, hw_tile, C), lambda b, h: (b, h, 0))
        gate_spec = pl.BlockSpec((1, 1, C), lambda b, h: (b, 0, 0))
        gate_shape = (B, 1, C)
        sum_scratch = pltpu.VMEM((1, C), jnp.float32)
    else:
        x_tile_spec = pl.BlockSpec((1, C, hw_tile), lambda b, h: (b, 0, h))
        gate_spec = pl.BlockSpec((1, C, 1), lambda b, h: (b, 0, 0))
        gate_shape = (B, C, 1)
        sum_scratch = pltpu.VMEM((C, 1), jnp.float32)
    w_specs_2d = [pl.BlockSpec((C, Cr), lambda b, h: (0, 0)),
                  pl.BlockSpec((1, Cr), lambda b, h: (0, 0)),
                  pl.BlockSpec((Cr, C), lambda b, h: (0, 0)),
                  pl.BlockSpec((1, C), lambda b, h: (0, 0))]

    # Pass 1: spatial sums + excitation MLP folded into the epilogue -> gate.
    gate = pl.pallas_call(
        functools.partial(_pool_gate_kernel, hw_total=HW, hw_tile=hw_tile,
                          mask_tail=mask_tail, channels_last=channels_last),
        out_shape=jax.ShapeDtypeStruct(gate_shape, dtype),
        grid=(B, n_hw),
        in_specs=[x_tile_spec] + w_specs_2d,
        out_specs=gate_spec,
        scratch_shapes=[sum_scratch],
        compiler_params=pltpu.CompilerParams(
            dimension_semantics=("parallel", "arbitrary"),
            vmem_limit_bytes=vmem_limit),
    )(xr, w1, b1r, w2, b2r)

    # Pass 2: channel-wise scale, fully parallel over (B, HW tiles).
    out = pl.pallas_call(
        _scale_kernel,
        out_shape=jax.ShapeDtypeStruct(xr.shape, dtype),
        grid=(B, n_hw),
        in_specs=[x_tile_spec, gate_spec],
        out_specs=x_tile_spec,
        compiler_params=pltpu.CompilerParams(
            dimension_semantics=("parallel", "parallel"),
            vmem_limit_bytes=vmem_limit),
    )(xr, gate)
    return out.reshape(x.shape)


# ---------------------------------------------------------------------------
# Demo / self-check
# ---------------------------------------------------------------------------

if __name__ == "__main__":
    def ref_nchw(x, w1, b1, w2, b2):
        pooled = jnp.mean(x, axis=(2, 3))
        y = jax.nn.sigmoid(jnp.maximum(pooled @ w1 + b1, 0.0) @ w2 + b2)
        return x * y[:, :, None, None]

    def ref_nhwc(x, w1, b1, w2, b2):
        pooled = jnp.mean(x, axis=(1, 2))
        y = jax.nn.sigmoid(jnp.maximum(pooled @ w1 + b1, 0.0) @ w2 + b2)
        return x * y[:, None, None, :]

    # Tolerance allows for MXU default-precision on the tiny excitation dots.
    def check(got, want):
        assert got.shape == want.shape and got.dtype == want.dtype
        assert jnp.allclose(got, want, atol=2e-3, rtol=2e-3), \
            float(jnp.max(jnp.abs(got - want)))

    keys = iter(jax.random.split(jax.random.PRNGKey(0), 16))

    # --- NCHW tests: C = 16, reduction = 8 -> Cr = 2 -------------------------
    B, C, Cr = 2, 16, 2
    w1 = jax.random.normal(next(keys), (C, Cr), jnp.float32) * 0.1
    b1 = jax.random.normal(next(keys), (Cr,), jnp.float32) * 0.1
    w2 = jax.random.normal(next(keys), (Cr, C), jnp.float32) * 0.1
    b2 = jax.random.normal(next(keys), (C,), jnp.float32) * 0.1

    # 1) fused single-pass path (small spatial map)
    x = jax.random.normal(next(keys), (B, C, 8, 8), jnp.float32)
    check(jax.block_until_ready(se_layer(x, w1, b1, w2, b2)),
          ref_nchw(x, w1, b1, w2, b2))

    # 2) two-pass tiled path, HW tiled evenly (256 = 2 x 128)
    x = jax.random.normal(next(keys), (B, C, 16, 16), jnp.float32)
    check(jax.block_until_ready(
              se_layer(x, w1, b1, w2, b2, force_two_pass=True, hw_tile=128)),
          ref_nchw(x, w1, b1, w2, b2))

    # 3) two-pass tiled path with a masked tail tile (HW = 144)
    x = jax.random.normal(next(keys), (B, C, 12, 12), jnp.float32)
    check(jax.block_until_ready(
              se_layer(x, w1, b1, w2, b2, force_two_pass=True, hw_tile=128)),
          ref_nchw(x, w1, b1, w2, b2))

    # 4) manual-DMA in-place fused path (forced)
    x = jax.random.normal(next(keys), (B, C, 16, 16), jnp.float32)
    check(jax.block_until_ready(se_layer(x, w1, b1, w2, b2, force_manual=True)),
          ref_nchw(x, w1, b1, w2, b2))

    # --- NHWC (channels-last, C on lanes): C = 128, reduction = 8 -> Cr = 16 -
    C, Cr = 128, 16
    w1 = jax.random.normal(next(keys), (C, Cr), jnp.float32) * 0.1
    b1 = jax.random.normal(next(keys), (Cr,), jnp.float32) * 0.1
    w2 = jax.random.normal(next(keys), (Cr, C), jnp.float32) * 0.1
    b2 = jax.random.normal(next(keys), (C,), jnp.float32) * 0.1

    # 5) fused, lane-dense 7x7 spatial map (HW = 49 < 128, C on lanes)
    x = jax.random.normal(next(keys), (B, 7, 7, C), jnp.float32)
    check(jax.block_until_ready(se_layer(x, w1, b1, w2, b2, channels_last=True)),
          ref_nhwc(x, w1, b1, w2, b2))

    # 6) two-pass NHWC with a masked (sublane) tail tile (49 = 3*16 + 1)
    check(jax.block_until_ready(
              se_layer(x, w1, b1, w2, b2, channels_last=True,
                       force_two_pass=True, hw_tile=16)),
          ref_nhwc(x, w1, b1, w2, b2))

    # 7) manual-DMA in-place fused path, NHWC
    check(jax.block_until_ready(
              se_layer(x, w1, b1, w2, b2, channels_last=True, force_manual=True)),
          ref_nhwc(x, w1, b1, w2, b2))

    print("KERNEL_OK")
</pallas_src>

<mosaic_0001>
module attributes {stable_mosaic.version = 11 : i64} {
  func.func @_se_fused_kernel(%arg0: i32, %arg1: memref<1x16x64xf32, #tpu.memory_space<vmem>>, %arg2: memref<16x2xf32, #tpu.memory_space<vmem>>, %arg3: memref<1x2xf32, #tpu.memory_space<vmem>>, %arg4: memref<2x16xf32, #tpu.memory_space<vmem>>, %arg5: memref<1x16xf32, #tpu.memory_space<vmem>>, %arg6: memref<1x16x64xf32, #tpu.memory_space<vmem>>) attributes {dimension_semantics = [#tpu.dimension_semantics<parallel>], iteration_bounds = array<i64: 2>, scalar_prefetch = 0 : i64, scratch_operands = 0 : i64, tpu.core_type = #tpu.core_type<tc>, window_params = [{transform_indices = @transform_0, window_bounds = array<i64: 1, 16, 64>}, {pipeline_mode = #tpu.pipeline_mode<synchronous>, transform_indices = @transform_1, window_bounds = array<i64: 16, 2>}, {pipeline_mode = #tpu.pipeline_mode<synchronous>, transform_indices = @transform_2, window_bounds = array<i64: 1, 2>}, {pipeline_mode = #tpu.pipeline_mode<synchronous>, transform_indices = @transform_3, window_bounds = array<i64: 2, 16>}, {pipeline_mode = #tpu.pipeline_mode<synchronous>, transform_indices = @transform_4, window_bounds = array<i64: 1, 16>}, {transform_indices = @transform_5, window_bounds = array<i64: 1, 16, 64>}]} {
    %c0 = arith.constant 0 : index
    %c0_0 = arith.constant 0 : index
    %c0_1 = arith.constant 0 : index
    %0 = vector.load %arg1[%c0, %c0_0, %c0_1] : memref<1x16x64xf32, #tpu.memory_space<vmem>>, vector<1x16x64xf32>
    %1 = vector.shape_cast %0 : vector<1x16x64xf32> to vector<16x64xf32>
    %cst = arith.constant dense<0.000000e+00> : vector<16xf32>
    %2 = vector.multi_reduction <add>, %1, %cst [1] : vector<16x64xf32> to vector<16xf32>
    %3 = vector.shape_cast %2 : vector<16xf32> to vector<16x1xf32>
    %4 = vector.shape_cast %3 : vector<16x1xf32> to vector<1x16xf32>
    %cst_2 = arith.constant 1.562500e-02 : f32
    %5 = vector.broadcast %cst_2 : f32 to vector<1x16xf32>
    %6 = arith.mulf %4, %5 : vector<1x16xf32>
    %c0_3 = arith.constant 0 : index
    %c0_4 = arith.constant 0 : index
    %7 = vector.load %arg2[%c0_3, %c0_4] : memref<16x2xf32, #tpu.memory_space<vmem>>, vector<16x2xf32>
    %cst_5 = arith.constant dense<0.000000e+00> : vector<1x2xf32>
    %8 = tpu.matmul %6, %7, %cst_5 {dimension_numbers = #tpu.dot_dimension_numbers<[1], [0], [0], [1], [0, 0, 1, 1], [], []>} : vector<1x16xf32>, vector<16x2xf32>, vector<1x2xf32> -> vector<1x2xf32>
    %c0_6 = arith.constant 0 : index
    %c0_7 = arith.constant 0 : index
    %9 = vector.load %arg3[%c0_6, %c0_7] : memref<1x2xf32, #tpu.memory_space<vmem>>, vector<1x2xf32>
    %10 = arith.addf %8, %9 : vector<1x2xf32>
    %cst_8 = arith.constant 0.000000e+00 : f32
    %11 = vector.broadcast %cst_8 : f32 to vector<1x2xf32>
    %12 = arith.maximumf %10, %11 : vector<1x2xf32>
    %c0_9 = arith.constant 0 : index
    %c0_10 = arith.constant 0 : index
    %13 = vector.load %arg4[%c0_9, %c0_10] : memref<2x16xf32, #tpu.memory_space<vmem>>, vector<2x16xf32>
    %cst_11 = arith.constant dense<0.000000e+00> : vector<1x16xf32>
    %14 = tpu.matmul %12, %13, %cst_11 {dimension_numbers = #tpu.dot_dimension_numbers<[1], [0], [0], [1], [0, 0, 1, 1], [], []>} : vector<1x2xf32>, vector<2x16xf32>, vector<1x16xf32> -> vector<1x16xf32>
    %c0_12 = arith.constant 0 : index
    %c0_13 = arith.constant 0 : index
    %15 = vector.load %arg5[%c0_12, %c0_13] : memref<1x16xf32, #tpu.memory_space<vmem>>, vector<1x16xf32>
    %16 = arith.addf %14, %15 : vector<1x16xf32>
    %17 = arith.negf %16 : vector<1x16xf32>
    %18 = math.exp %17 : vector<1x16xf32>
    %cst_14 = arith.constant 1.000000e+00 : f32
    %19 = vector.broadcast %cst_14 : f32 to vector<1x16xf32>
    %20 = arith.addf %19, %18 : vector<1x16xf32>
    %21 = arith.divf %19, %20 : vector<1x16xf32>
    %22 = vector.shape_cast %21 : vector<1x16xf32> to vector<16x1xf32>
    %23 = vector.broadcast %22 : vector<16x1xf32> to vector<16x64xf32>
    %24 = arith.mulf %1, %23 : vector<16x64xf32>
    %c0_15 = arith.constant 0 : index
    %c0_16 = arith.constant 0 : index
    %c0_17 = arith.constant 0 : index
    %25 = vector.load %arg6[%c0_15, %c0_16, %c0_17] : memref<1x16x64xf32, #tpu.memory_space<vmem>>, vector<1x16x64xf32>
    %26 = vector.shape_cast %25 : vector<1x16x64xf32> to vector<16x64xf32>
    %27 = vector.shape_cast %24 : vector<16x64xf32> to vector<1x16x64xf32>
    tpu.vector_store %arg6[%c0_15, %c0_16, %c0_17], %27 {strides = array<i32>} : memref<1x16x64xf32, #tpu.memory_space<vmem>>, vector<1x16x64xf32>,
    return
  }
  func.func @transform_0(%arg0: i32) -> (i32, i32, i32) {
    %c0_i32 = arith.constant 0 : i32
    %c0_i32_0 = arith.constant 0 : i32
    %c0_i32_1 = arith.constant 0 : i32
    return %arg0, %c0_i32, %c0_i32_0 : i32, i32, i32
  }
  func.func @transform_1(%arg0: i32) -> (i32, i32) {
    %c0_i32 = arith.constant 0 : i32
    %c0_i32_0 = arith.constant 0 : i32
    %c0_i32_1 = arith.constant 0 : i32
    return %c0_i32, %c0_i32_0 : i32, i32
  }
  func.func @transform_2(%arg0: i32) -> (i32, i32) {
    %c0_i32 = arith.constant 0 : i32
    %c0_i32_0 = arith.constant 0 : i32
    %c0_i32_1 = arith.constant 0 : i32
    return %c0_i32, %c0_i32_0 : i32, i32
  }
  func.func @transform_3(%arg0: i32) -> (i32, i32) {
    %c0_i32 = arith.constant 0 : i32
    %c0_i32_0 = arith.constant 0 : i32
    %c0_i32_1 = arith.constant 0 : i32
    return %c0_i32, %c0_i32_0 : i32, i32
  }
  func.func @transform_4(%arg0: i32) -> (i32, i32) {
    %c0_i32 = arith.constant 0 : i32
    %c0_i32_0 = arith.constant 0 : i32
    %c0_i32_1 = arith.constant 0 : i32
    return %c0_i32, %c0_i32_0 : i32, i32
  }
  func.func @transform_5(%arg0: i32) -> (i32, i32, i32) {
    %c0_i32 = arith.constant 0 : i32
    %c0_i32_0 = arith.constant 0 : i32
    %c0_i32_1 = arith.constant 0 : i32
    return %arg0, %c0_i32, %c0_i32_0 : i32, i32, i32
  }
}

</mosaic_0001>

<bundles_post_ra>
// kernel: tpu_custom_call.1
= control target key start
LH: loop header
LB: loop body
LE: loop exit
PB: predicated region body
PF: predicated region fallthrough
CT: control target
= control target key end

     0   :  { %10 = vsyncpa [#allocation3], 0  ;;  %s957_s0 = inlined_call_operand.hbm [shape: f32[2,16,64], index: 0, kind: input, shape index: {}]   ;;  %s958_s1 = inlined_call_operand.vmem [shape: f32[16,2], index: 1, kind: input, shape index: {}]   ;;  %s959_s2 = inlined_call_operand.vmem [shape: f32[1,2], index: 2, kind: input, shape index: {}]   ;;  %s960_s3 = inlined_call_operand.vmem [shape: f32[2,16], index: 3, kind: input, shape index: {}]   ;;  %s961_s4 = inlined_call_operand.vmem [shape: f32[1,16], index: 4, kind: input, shape index: {}]   ;;  %s962_s5 = inlined_call_operand.hbm [shape: f32[2,16,64], index: 5, kind: output, shape index: {}]  }
   0x1   :  { %12 = vsyncpa [#allocation3 + $0x1], 0 }
   0x2   :  { %13 = vsyncpa [#allocation4], 0 }
   0x3   :  { %15 = vsyncpa [#allocation4 + $0x1], 0  ;;  %s768_s18 = smov 0   ;;  %s770_s19 = smov 0  }
   0x4   :  { %s772_s20 = smov 0   ;;  %s774_s21 = smov 0  }
   0x5 LB: > { %s789_s22 = sadd.s32 4294967295, %s727_s21   ;;  %s534_s23 = sadd.s32 4294967294, %s727_s21   ;;  %s727_s21 = sphi %s774_s21, %s975_s21   ;;  %s723_s20 = sphi %s772_s20, %s974_s20   ;;  %s719_s19 = sphi %s770_s19, %s973_s19   ;;  %s715_s18 = sphi %s768_s18, %s972_s18  }
   0x6   : > { %s793_s24 = sadd.s32 1, %s727_s21   ;;  %s28_s25 = sadd.s32 1, %s723_s20 }
   0x7   : > { %s25_s26 = ssub.s32 %s727_s21, %s793_s24  ;;  %p35_p0 = scmp.ne.s32.totalorder %s723_s20, %s719_s19 }
   0x8   : > { %p26_p1 = scmp.eq.s32.totalorder %s25_s26, 0  ;;  %p36_p2 = scmp.eq.s32.totalorder %s727_s21, 0 }
   0x9   : > { %p41_p3 = scmp.ne.s32.totalorder %s719_s19, %s715_s18  ;;  %p42_p4 = scmp.eq.s32.totalorder %s789_s22, 0 }
   0xa   : > { %s805_s27 = scalar_select %p26_p1, %s723_s20, %s28_s25  }
   0xb   : > { %p807_p5 = por %p36_p2, %p35_p0  ;;  %p811_p6 = por %p42_p4, %p41_p3 }
   0xc   : > { %p149_p7 = scmp.eq.s32.totalorder %s789_s22, 1  ;;  %p155_p8 = scmp.eq.s32.totalorder %s534_s23, 1 }
   0xd   : > { %p586_p10 = scmp.lt.s32.totalorder %s727_s21, 2  ;;  %s187_s7 = sand.u32 1, %s723_s20  }
   0xe   : > { %p818_p11 = por %p149_p7, %p35_p0  ;;  %p822_p12 = por %p155_p8, %p41_p3 }
   0xf   : > { %s552_s8 = sshll.u32 %s727_s21, 8  ;;  %s537_s9 = sshll.u32 %s187_s7, 4 }
  0x10   : > { %s966_s30 = scalar_select %p818_p11, 1, 0 }
  0x11   : > { %s967_s6 = scalar_select %p822_p12, 1, 0 }
  0x12   : > { %s831_s12 = scalar_lea.hbm %s957_s0, %s552_s8  ;;  %s191_s13 = scalar_lea.vmem [#allocation2], %s537_s9 }
  0x13   : > { %s198_s14 = sshll.u32 %s191_s13, 4  ;;  %p835_p13 = pnand %p586_p10, %p807_p5  ;;  %s839_s14 = int_to_ptr.vmem [resolvable:$true] %s198_s14 }
  0x14   : > { %s841_s16 = scalar_lea.sflag [#allocation3], %s187_s7  ;;  %s631_s17 = scalar_lea.hbm %s831_s12, 256 }
  0x15   : > { %p632_p0 = scmp.ne.s32.totalorder %s831_s12, %s631_s17  ;;  %p633_p1 = pneg %p835_p13 }
  0x16   : > { %s636_s26 = scalar_lea.hbm %s957_s0, 512  ;;  %p637_p4 = scmp.lt.u32.totalorder %s831_s12, %s957_s0 }
  0x17   : > { %p634_p2 = pnand %p633_p1, %p632_p0  ;;  %p638_p5 = scmp.lt.u32.totalorder %s636_s26, %s631_s17 }
  0x18   : > { %p640_p8 = scmp.lt.u32.totalorder %s631_s17, %s831_s12 }
  0x19   : > { %p635_p3 = pneg %p634_p2  ;;  %p639_p7 = por %p638_p5, %p637_p4 }
  0x1b   : > { %p641_p10 = por %p640_p8, %p639_p7 }
  0x1d   : > { %p642_p9 = pnand %p641_p10, %p635_p3 }
  0x1f   : > { %645 = shalt.err (!%p642_p9)
}
  0x20   : > { %s646_s7 = scalar_lea.vmem %s839_s14, 256  ;;  %s729_s9 = smov [#allocation2]  }
  0x21   : > { %p647_p0 = scmp.ne.s32.totalorder %s839_s14, %s646_s7  ;;  %s651_s10 = sshll.u32 %s729_s9, 4  ;;  %s652_s10 = int_to_ptr.vmem [resolvable:$false] %s651_s10 }
  0x22   : > { %s653_s11 = scalar_lea.vmem %s652_s10, 512  ;;  %p654_p11 = scmp.lt.s32.totalorder %s839_s14, %s652_s10 }
  0x23   : > { %p649_p2 = pnand %p647_p0, %p633_p1  ;;  %p655_p4 = scmp.lt.s32.totalorder %s653_s11, %s646_s7 }
  0x25   : > { %p650_p12 = pneg %p649_p2  ;;  %p656_p5 = por %p655_p4, %p654_p11 }
  0x27   : > { %p657_p7 = pnand %p656_p5, %p650_p12 }
  0x29   : > { %660 = shalt.err (!%p657_p7)
}
  0x2a   : > { %s730_s13 = smov 128   ;;  %s731_s17 = smov 8  }
  0x2b   : > { %581 = dma.hbm_to_vmem [thread:$0]  (!%p835_p13), %s831_s12, 256, %s839_s14, %s841_s16, %s730_s13, %s730_s13, %s731_s17  }
  0x2c   : > { %p540_p9 = scmp.ge.s32.totalorder %s727_s21, 1  ;;  %p206_p1 = scmp.lt.s32.totalorder %s727_s21, 3 }
  0x2e   : > { %p207_p3 = pnand %p540_p9, %p206_p1 }
  0x2f   : > { %s872_s23 = sand.u32 (!%p207_p3), 1, %s719_s19  }
  0x30   : > { %210 = sbr.rel (%p207_p3) target bundleno = 803 (0x323), region = 40  ;;  %s541_s25 = sshll.u32 (!%p207_p3), %s872_s23, 4 }
  0x31   : > { %s213_s26 = scalar_lea.sflag (!%p207_p3), [#allocation3], %s872_s23  ;;  %s216_s28 = scalar_lea.vmem (!%p207_p3), [#allocation2], %s541_s25 }
  0x37   : > { %706 = dma.done.wait (%p811_p6), %s213_s26, 256  }
  0x38   : > { %708 = vsyncadd (%p811_p6), %s213_s26, 4294967040  ;;  %vm245_vm0 = vcmask 523264   ;;  %v243_v0 = vld [vmem:[%s216_s28] sm:$0xff]  ;;  %v882_v1 = vld [vmem:[%s216_s28 + $0x8] sm:$0xff]  ;;  %v732_v7 = vmov 0.0|0.0   ;;  %vm733_vm1 = vmmov 0   ;;  %v259_v9 = vlaneseq }
  0x39   : > { %v246_v2 = vsel %vm245_vm0, %v243_v0, 0.0  ;;  %v249_v3 = vsel %vm245_vm0, %v882_v1, 0.0  ;;  %v254_v4 = vld [vmem:[%s958_s1] sm:$0xff]  ;;  %v255_v5 = vld [vmem:[%s958_s1 + $0x8] sm:$0xff]  ;;  %571 = vmatprep.subr.bf16.mxu0 %v732_v7  ;;  %v734_v8 = vmov 0.0   ;;  %vm270_vm2 = vcmask 130112  }
  0x3a   : > { %247 = vadd.xlane.f32.xlu0 %v246_v2  ;;  %v572_v6 = vpack.c.bf16 %v255_v5, %v254_v4  ;;  %563 = vmatprep.mubr.msk.f32.mxu0 %vm733_vm1, %v734_v8  ;;  %v260_v10 = vand.u32 127, %v259_v9  ;;  %v262_v11 = vshrl.u32 %v259_v9, 7  ;;  %vm272_vm3 = vcmask 130048   ;;  %v346_v22 = vld [vmem:[%s960_s3] sm:$0x3]  ;;  %s242_s13 = scalar_lea.vmem [#allocation5], %s541_s25 }
  0x3b   : > { %566 = vmatprep.subr.mxu1 %v734_v8  ;;  %568 = vmatprep.mubr.msk.f32.mxu1 %vm733_vm1, %v734_v8  ;;  %vm352_vm4 = vcmask 1041408   ;;  %v256_v23 = vld [vmem:[%s959_s2] sm:$0x1]  ;;  %vm348_vm5 = vcmask 15360   ;;  %s461_s17 = sshll.u32 %s242_s13, 4  ;;  %s553_s26 = sshll.u32 %s789_s22, 8  ;;  %s905_s17 = int_to_ptr.vmem [resolvable:$true] %s461_s17 }
  0x3c   : > { %573 = vmatpush3.bf16.msra.mxu0 %v572_v6  ;;  %v265_v12 = vadd.s32 4294967288, %v260_v10  ;;  %v263_v14 = vsub.s32 %v260_v10, %v262_v11  ;;  %567 = vmatpush3.msk.msra.mxu1 %vm352_vm4, %v346_v22  ;;  %v347_v28 = vld [vmem:[%s961_s4] sm:$0x1]  ;;  %v434_v35 = vsub.s32 0, %v262_v11  ;;  %s911_s14 = scalar_lea.hbm %s962_s5, %s553_s26  ;;  %s448_s25 = scalar_lea.sflag [#allocation4], %s872_s23 }
  0x3d   : > { %s661_s15 = scalar_lea.vmem %s905_s17, 256  ;;  %p969_p11 = scmp.ne.s32.totalorder %s966_s30, 0 }
  0x3e   : > { %250 = vadd.xlane.f32.xlu0 %v249_v3  ;;  %v268_v16 = vsub.s32 %v265_v12, %v262_v11  ;;  %p662_p6 = scmp.ne.s32.totalorder %s905_s17, %s661_s15  ;;  %s735_s22 = smov [#allocation5]  }
  0x3f   : > { %s665_s16 = sshll.u32 %s735_s22, 4  ;;  %s666_s16 = int_to_ptr.vmem [resolvable:$false] %s665_s16 }
  0x40   : > { %p663_p12 = pnand %p662_p6, %p969_p11  ;;  %s667_s29 = scalar_lea.vmem %s666_s16, 512 }
  0x41   : > { %p668_p8 = scmp.lt.s32.totalorder %s905_s17, %s666_s16  ;;  %p669_p10 = scmp.lt.s32.totalorder %s667_s29, %s661_s15 }
  0x42   : > { %p664_p13 = pneg %p663_p12 }
  0x43   : > { %p670_p0 = por %p669_p10, %p668_p8 }
  0x45   : > { %p671_p2 = pnand %p670_p0, %p664_p13 }
  0xc7   : > { %v248_v13 = vpop.xlane.xlu0 %247 }
  0xc8   : > { %v252_v15 = vmul.f32 0.015625, %v248_v13 }
  0xca   : > { %v264_v19 = vrot.slane %v252_v15, %v263_v14 }
  0xcb   : > { %v251_v17 = vpop.xlane.xlu0 %250 }
  0xcc   : > { %v253_v18 = vmul.f32 0.015625, %v251_v17 }
  0xce   : > { %v269_v20 = vrot.slane %v253_v18, %v268_v16 }
  0xd0   : > { %v271_v21 = vsel %vm270_vm2, %v269_v20, %v264_v19 }
  0xd1   : > { %564 = vmatmul.mubr.msk.f32.vlgmr.msra.gmra.mrb[0].mxu0 %vm272_vm3, %v271_v21 }
 0x1a4   : > { %v341_v24 = vpop.f32.mrb[0].mxu0 }
 0x1a5   : > { %v342_v25 = vadd.f32 %v341_v24, %v256_v23  ;;  %v565_v26 = vpop.f32.mrb[1].mxu0 }
 0x1a7   : > { %v345_v27 = vmax.f32 %v342_v25, 0.0 }
 0x1a9   : > { %569 = vmatmul.mubr.msk.f32.vlgmr.msra.gmra.mrb[0].mxu1 %vm348_vm5, %v345_v27 }
 0x27c   : > { %v422_v29 = vpop.f32.mrb[0].mxu1 }
 0x27d   : > { %v423_v30 = vadd.f32 %v422_v29, %v347_v28  ;;  %v570_v31 = vpop.f32.mrb[1].mxu1 }
 0x27f   : > { %v546_v32 = vmul.f32 -1.442695, %v423_v30 }
 0x281   : > { %627 = vpow2.f32 %v546_v32 }
 0x28b   : > { %v628_v33 = vpop.eup %627 }
 0x28c   : > { %v429_v34 = vadd.f32 1.0, %v628_v33 }
 0x28e   : > { %629 = vrcp.f32 %v429_v34 }
 0x298   : > { %v630_v36 = vpop.eup %629 }
 0x299   : > { %v435_v37 = vrot.slane %v630_v36, %v434_v35 }
 0x29b   : > { %437 = vbcast.lane.b32.xlu1 %v435_v37, 256 }
 0x29f   : > { %441 = vbcast.lane.b32.xlu1 %v435_v37, 264 }
 0x30d   : > { %v438_v38 = vpop.permute.xlu1 %437 }
 0x30e   : > { %v443_v39 = vmul.f32 %v438_v38, %v243_v0 }
 0x310   : > { %445 = vst.msk [vmem:[%s242_s13] sm:$0xff] %vm245_vm0, %v443_v39 }
 0x311   : > { %v442_v40 = vpop.permute.xlu1 %441 }
 0x312   : > { %v444_v41 = vmul.f32 %v442_v40, %v882_v1 }
 0x314   : > { %446 = vst.msk [vmem:[%s242_s13 + $0x8] sm:$0xff] %vm245_vm0, %v444_v41 }
 0x315   : > { %674 = shalt.err (!%p671_p2)
}
 0x316   : > { %s675_s8 = scalar_lea.hbm %s911_s14, 256  ;;  %s679_s10 = scalar_lea.hbm %s962_s5, 512 }
 0x317   : > { %p676_p4 = scmp.ne.s32.totalorder %s911_s14, %s675_s8  ;;  %p680_p9 = scmp.lt.u32.totalorder %s911_s14, %s962_s5 }
 0x318   : > { %p681_p1 = scmp.lt.u32.totalorder %s679_s10, %s675_s8  ;;  %p683_p6 = scmp.lt.u32.totalorder %s675_s8, %s911_s14 }
 0x319   : > { %p677_p5 = pnand %p676_p4, %p969_p11 }
 0x31a   : > { %p682_p3 = por %p681_p1, %p680_p9 }
 0x31b   : > { %p678_p7 = pneg %p677_p5 }
 0x31c   : > { %p684_p12 = por %p683_p6, %p682_p3 }
 0x31e   : > { %p685_p13 = pnand %p684_p12, %p678_p7 }
 0x320   : > { %688 = shalt.err (!%p685_p13)
}
 0x321   : > { %s736_s26 = smov 128   ;;  %s737_s28 = smov 8  }
 0x322   : > { %576 = dma.vmem_to_hbm [thread:$0]  (%p969_p11), %s905_s17, 256, %s911_s14, %s448_s25, %s736_s26, %s736_s26, %s737_s28  }
 0x323 PF: > { %s476_s12 = sand.u32 1, %s715_s18   ;;  %p970_p8 = scmp.ne.s32.totalorder %s967_s6, 0 }
 0x324   : > { %p971_p10 = scmp.ge.s32.totalorder %s727_s21, 2  ;;  %s477_s15 = scalar_lea.sflag [#allocation4], %s476_s12 }
 0x326   : > { %p583_p0 = pnand %p971_p10, %p970_p8 }
 0x328   : > { %710 = dma.done.wait (!%p583_p0), %s477_s15, 256  }
 0x329   : > { %712 = vsyncadd (!%p583_p0), %s477_s15, 4294967040  ;;  %p18_p2 = scmp.ge.s32.totalorder %s793_s24, 4   ;;  %s972_s18 = smov %s719_s19 }
 0x32a   : > { %s973_s19 = smov %s723_s20  ;;  %s974_s20 = smov %s805_s27 }
 0x32b   : > { %s975_s21 = smov %s793_s24  ;;  %20 = sbr.rel (!%p18_p2) target bundleno = 5 (0x5), region = 85 }
 0x332   :  { %482 = vsyncpa [#allocation3], 1 }
 0x333   :  { %484 = vsyncpa [#allocation3 + $0x1], 1 }
 0x334   :  { %485 = vsyncpa [#allocation4], 1 }
 0x335   :  { %487 = vsyncpa [#allocation4 + $0x1], 1 }

</bundles_post_ra>
